<compile_context>
chip_gen: v5e
topology: v5e:2x2
jax: 0.10.0
libtpu: 0.0.40
codegen_flags: <defaults>
</compile_context>

<pallas_src>
import functools
import math

import jax
import jax.numpy as jnp
from jax.experimental import pallas as pl
from jax.experimental.pallas import tpu as pltpu


def _bottle_cbn_kernel(xs_ref, wb_ref, rblk_ref, gamma_ref, beta_ref, alpha_ref,
                       o_ref, *, img_w, batch, eps):
    """Fused 3x3 conv (one banded matmul) + conditional batch-norm + PReLU.

    Lane layout of o_ref / gamma / beta / rblk / wb columns is channel-major:
    lane index = c_local * W + w  (lane-dense: lane_tile is a multiple of 128).

    xs_ref    : (B*H, 3*W*Cin)   shifted-stacked input, row = b*H + h,
                                 column = kh*(W*Cin) + x*Cin + ci
    wb_ref    : (3*W*Cin, LN)    banded conv weight (W zero-padding folded in)
    rblk_ref  : (LN, LN)         block-diagonal ones (per-channel reduce+broadcast)
    gamma_ref : (B, LN)          per-batch CBN scale, repeated over w
    beta_ref  : (B, LN)          per-batch CBN shift, repeated over w
    alpha_ref : (1, 1) SMEM      PReLU slope
    o_ref     : (B*H, LN)        output (also used to stage the raw conv result)
    """
    BH, _ = xs_ref.shape
    LN = o_ref.shape[-1]
    W = img_w
    B = batch
    H = BH // B
    inv_n = 1.0 / float(BH * W)            # BN population = B*H*W per channel

    # ---- conv: single MXU matmul, M = B*H, K = 3*W*Cin, N = lane_tile --------
    conv = jnp.dot(xs_ref[...], wb_ref[...], preferred_element_type=jnp.float32)
    o_ref[...] = conv.astype(o_ref.dtype)          # stage conv in the output block

    # ---- BatchNorm2d training-mode stats (biased variance), eps = 1e-5 -------
    # Single-pass sums; per-channel reduce + broadcast across the (c*W + w) lane
    # layout via ONE matmul with the precomputed block-diagonal ones matrix.
    # NOTE: one-pass variance (E[x^2]-E[x]^2) can cancel for large-mean
    # activations; fine for this init, documented limitation.
    total = jnp.sum(conv, axis=0, keepdims=True)                  # (1, LN)
    totsq = jnp.sum(conv * conv, axis=0, keepdims=True)           # (1, LN)
    stats = jnp.concatenate([total, totsq], axis=0)               # (2, LN)
    red = jnp.dot(stats, rblk_ref[...], preferred_element_type=jnp.float32) * inv_n
    mean_l = red[0:1, :]
    msq_l = red[1:2, :]
    var_l = jnp.maximum(msq_l - mean_l * mean_l, 0.0)
    inv_l = jax.lax.rsqrt(var_l + eps)                            # (1, LN)

    # ---- fold BN + conditional affine into one scale/shift per image, PReLU --
    # Static per-b slices (B is a small compile-time constant); per-iteration
    # intermediates die each iteration, so vreg live ranges stay bounded.
    a = alpha_ref[0, 0]
    for b in range(B):
        g = gamma_ref[pl.ds(b, 1), :]                             # (1, LN)
        bt = beta_ref[pl.ds(b, 1), :]
        scale = g * inv_l
        shift = bt - scale * mean_l
        blk = o_ref[pl.ds(b * H, H), :]                           # staged conv rows
        out = blk * scale + shift
        o_ref[pl.ds(b * H, H), :] = jnp.where(out >= 0, out, a * out).astype(o_ref.dtype)


def _build_band_weights(conv_w_sn, W):
    """wb[kh, x*Cin + ci, co*W + w] = conv_w_sn[co, ci, kh, kw] where x = w + kw - 1.

    The band structure only includes in-range x, so the conv's zero padding
    along W is handled for free."""
    Cout, Cin, KH, KW = conv_w_sn.shape
    kw = jnp.arange(KW)[:, None, None]
    x_in = jnp.arange(W)[None, :, None]
    w_out = jnp.arange(W)[None, None, :]
    shift = (x_in == w_out + kw - 1).astype(jnp.float32)          # (KW, W, W)
    w_hwio = jnp.transpose(conv_w_sn, (2, 3, 1, 0)).astype(jnp.float32)  # (kh,kw,ci,co)
    wb = jnp.einsum('kxw,hkic->hxicw', shift, w_hwio)             # (KH, W, Cin, Cout, W)
    return wb.reshape(KH, W * Cin, Cout * W)


def _choose_channel_tile(cpad, W):
    """Pick channels-per-tile so lane_tile = tcout*W is lane-dense (mult of 128),
    <= 512 lanes, and yields >=2 tiles when the total lane width >= 256 (v7x has
    two TensorCores on the 'parallel' grid axis)."""
    divisors = [c for c in range(1, cpad + 1) if cpad % c == 0]
    dense = [c for c in divisors if (c * W) % 128 == 0 and c * W <= 512]
    if dense:
        if cpad * W >= 256:
            multi = [c for c in dense if c < cpad]
            if multi:
                return max(multi)
        return max(dense)
    # No lane-dense sub-tile exists: fall back to the full width (block equals
    # full array dim -> valid BlockSpec; stores may be masked).
    # TODO(synk): for very large non-128-aligned Cout*W add a spatial grid axis
    # instead of widening the single tile.
    return cpad


def bottle_cbn(x_nchw, style, conv_w_sn, style_w, style_b, prelu_a,
               compute_dtype=jnp.float32):
    """Wrapper: NCHW in / NCHW out. compute_dtype=jnp.bfloat16 enables bf16 MXU
    operands (big win on v5e); default f32 to stay inside the 2e-3 tolerance
    (bf16 path not re-verified at this contraction depth)."""
    B, Cin, H, W = x_nchw.shape
    Cout = conv_w_sn.shape[0]

    # --- tiny parameter prep, hoisted out of the kernel -------------------------
    # EqualLinear(512 -> 2*Cout) style projection (tiny matmul, XLA handles it).
    st = (style.astype(jnp.float32) @ style_w.T.astype(jnp.float32)
          + style_b.astype(jnp.float32))
    gamma_c = st[:, :Cout]                       # (B, Cout)
    beta_c = st[:, Cout:]

    # --- channel padding so the lane width is a multiple of 128 ----------------
    cpad = Cout
    for extra in range(129):                      # period of (c*W) mod 128 divides 128
        if ((Cout + extra) * W) % 128 == 0:
            cand = Cout + extra
            if cand * W <= max(2 * Cout * W, 256):   # don't pad if too wasteful
                cpad = cand
            break
    LNp = cpad * W

    if cpad > Cout:
        pad = cpad - Cout
        gamma_c = jnp.concatenate([gamma_c, jnp.ones((B, pad), jnp.float32)], axis=1)
        beta_c = jnp.concatenate([beta_c, jnp.zeros((B, pad), jnp.float32)], axis=1)
        conv_w_p = jnp.concatenate(
            [conv_w_sn, jnp.zeros((pad, Cin, 3, 3), conv_w_sn.dtype)], axis=0)
    else:
        conv_w_p = conv_w_sn

    gamma = jnp.repeat(gamma_c, W, axis=1)       # (B, cpad*W), lane = c*W + w
    beta = jnp.repeat(beta_c, W, axis=1)

    # Banded conv weights, kh folded into the contraction axis: (3*W*Cin, LNp).
    wb = _build_band_weights(conv_w_p, W).reshape(3 * W * Cin, LNp).astype(compute_dtype)
    alpha = jnp.full((1, 1), prelu_a, jnp.float32)

    # Shifted-stacked input (the conv's zero padding along H becomes zero rows
    # here; padding along W is folded into the band weights). One lane-dense
    # 2-D slab, so the kernel's conv is a single matmul with M = B*H.
    x2 = jnp.transpose(x_nchw, (0, 2, 3, 1)).reshape(B, H, W * Cin).astype(compute_dtype)
    zrow = jnp.zeros((B, 1, W * Cin), compute_dtype)
    x_up = jnp.concatenate([zrow, x2[:, :-1, :]], axis=1)        # row h -> input row h-1
    x_dn = jnp.concatenate([x2[:, 1:, :], zrow], axis=1)         # row h -> input row h+1
    xs = jnp.concatenate([x_up, x2, x_dn], axis=-1).reshape(B * H, 3 * W * Cin)

    # --- channel-tile choice ----------------------------------------------------
    tcout = _choose_channel_tile(cpad, W)
    lane_tile = tcout * W
    num_tiles = cpad // tcout

    # Block-diagonal ones matrix for the per-channel reduce+broadcast (same for
    # every channel tile -> constant index_map, built once here).
    lane_idx = jnp.arange(lane_tile)
    rblk = (lane_idx[:, None] // W == lane_idx[None, :] // W).astype(jnp.float32)

    # --- VMEM budget: derive from the real per-step footprint, clamp <= 32 MiB
    # (v7x physical VMEM is 64 MiB; v5e/v6e have 128 MiB). -----------------------
    # TODO(synk): mark the constant-index xs/rblk blocks pipeline_mode=pl.Buffered(1)
    # once single-buffering of constant blocks is verified on the target jax version.
    itemsize = jnp.dtype(compute_dtype).itemsize
    per_step = (2 * xs.size * itemsize                       # xs (double-buffered budget)
                + 2 * wb.shape[0] * lane_tile * itemsize     # wb tile
                + 2 * lane_tile * lane_tile * 4              # rblk
                + 2 * 2 * B * lane_tile * 4                  # gamma + beta tiles
                + 2 * (B * H) * lane_tile * 4)               # output tile
    vmem_limit = int(min(max(2 * per_step, 16 * 1024 * 1024), 32 * 1024 * 1024))

    kernel = functools.partial(_bottle_cbn_kernel, img_w=W, batch=B, eps=1e-5)

    # TODO(synk): for very large B*H*W activations add a spatial grid axis with
    # cross-tile sum/sumsq accumulation and a second normalization pass; the
    # current grid tiles only over output channels (which is BN-safe).
    out2 = pl.pallas_call(
        kernel,
        out_shape=jax.ShapeDtypeStruct((B * H, LNp), jnp.float32),
        grid=(num_tiles,),
        in_specs=[
            pl.BlockSpec((B * H, 3 * W * Cin), lambda c: (0, 0)),        # xs (shared)
            pl.BlockSpec((3 * W * Cin, lane_tile), lambda c: (0, c)),    # band weights
            pl.BlockSpec((lane_tile, lane_tile), lambda c: (0, 0)),      # rblk (shared)
            pl.BlockSpec((B, lane_tile), lambda c: (0, c)),              # gamma
            pl.BlockSpec((B, lane_tile), lambda c: (0, c)),              # beta
            pl.BlockSpec(memory_space=pltpu.MemorySpace.SMEM),           # PReLU slope
        ],
        out_specs=pl.BlockSpec((B * H, lane_tile), lambda c: (0, c)),
        compiler_params=pltpu.CompilerParams(
            dimension_semantics=("parallel",),
            vmem_limit_bytes=vmem_limit,
        ),
    )(xs, wb, rblk, gamma, beta, alpha)

    # (B*H, cpad*W) -> (B, cpad, H, W) -> drop padded channels
    out = jnp.transpose(out2.reshape(B, H, cpad, W), (0, 2, 1, 3))
    return out[:, :Cout]


def spectral_normalize(w, key, n_iter=1, eps=1e-12):
    """One power-iteration spectral norm (matches torch spectral_norm defaults).
    Pure parameter preprocessing -> plain JAX glue."""
    cout = w.shape[0]
    wm = w.reshape(cout, -1)
    u = jax.random.normal(key, (cout,), jnp.float32)
    u = u / (jnp.linalg.norm(u) + eps)
    v = None
    for _ in range(n_iter):
        v = wm.T @ u
        v = v / (jnp.linalg.norm(v) + eps)
        u = wm @ v
        u = u / (jnp.linalg.norm(u) + eps)
    sigma = u @ (wm @ v)
    return w / sigma


def reference(x_nchw, style, conv_w_sn, style_w, style_b, prelu_a):
    """Plain-JAX reference of the PyTorch forward for verification."""
    x = jnp.transpose(x_nchw, (0, 2, 3, 1))
    w_hwio = jnp.transpose(conv_w_sn, (2, 3, 1, 0))
    conv = jax.lax.conv_general_dilated(
        x, w_hwio, (1, 1), 'SAME', dimension_numbers=('NHWC', 'HWIO', 'NHWC'))
    mean = jnp.mean(conv, axis=(0, 1, 2), keepdims=True)
    var = jnp.mean((conv - mean) ** 2, axis=(0, 1, 2), keepdims=True)
    normed = (conv - mean) / jnp.sqrt(var + 1e-5)
    st = style @ style_w.T + style_b
    c = conv.shape[-1]
    gamma = st[:, :c][:, None, None, :]
    beta = st[:, c:][:, None, None, :]
    out = gamma * normed + beta
    out = jnp.where(out >= 0, out, prelu_a * out)
    return jnp.transpose(out, (0, 3, 1, 2))


if __name__ == "__main__":
    B, Cin, Cout, H, W = 2, 4, 8, 16, 16
    STYLE_DIM = 512  # fixed by EqualLinear(512, ...) in the module

    key = jax.random.PRNGKey(0)
    k1, k2, k3, k4, k5 = jax.random.split(key, 5)

    x = jax.random.normal(k1, (B, Cin, H, W), jnp.float32)
    style = jax.random.normal(k2, (B, STYLE_DIM), jnp.float32)

    # Conv weight (Cout, Cin, 3, 3), spectrally normalized as in the forward pass.
    conv_w = jax.random.normal(k3, (Cout, Cin, 3, 3), jnp.float32) * 0.1
    conv_w_sn = spectral_normalize(conv_w, k4)

    # EqualLinear(512, 2*Cout): weight_orig ~ N(0,1), effective weight * sqrt(2/512),
    # bias[:Cout]=1, bias[Cout:]=0 (ConditionalBatchNorm init).
    style_w = jax.random.normal(k5, (2 * Cout, STYLE_DIM), jnp.float32) * math.sqrt(2.0 / STYLE_DIM)
    style_b = jnp.concatenate([jnp.ones((Cout,), jnp.float32),
                               jnp.zeros((Cout,), jnp.float32)])
    prelu_a = 0.25  # nn.PReLU() default single-parameter init

    out = bottle_cbn(x, style, conv_w_sn, style_w, style_b, prelu_a)
    out = jax.block_until_ready(out)

    ref = reference(x, style, conv_w_sn, style_w, style_b, prelu_a)
    max_err = float(jnp.max(jnp.abs(out - ref)))
    assert out.shape == (B, Cout, H, W), out.shape
    assert max_err < 2e-3, f"max abs error {max_err}"

    # TODO(synk): BatchNorm running-stat updates / spectral-norm u-vector updates are
    # training-time side effects with no effect on this forward output; not modeled.
    print("KERNEL_OK")
</pallas_src>

<mosaic_0001>
module attributes {stable_mosaic.version = 11 : i64} {
  func.func @_bottle_cbn_kernel(%arg0: i32, %arg1: memref<32x192xf32, #tpu.memory_space<vmem>>, %arg2: memref<192x128xf32, #tpu.memory_space<vmem>>, %arg3: memref<128x128xf32, #tpu.memory_space<vmem>>, %arg4: memref<2x128xf32, #tpu.memory_space<vmem>>, %arg5: memref<2x128xf32, #tpu.memory_space<vmem>>, %arg6: memref<1x1xf32, #tpu.memory_space<smem>>, %arg7: memref<32x128xf32, #tpu.memory_space<vmem>>) attributes {dimension_semantics = [#tpu.dimension_semantics<parallel>], iteration_bounds = array<i64: 1>, scalar_prefetch = 0 : i64, scratch_operands = 0 : i64, tpu.core_type = #tpu.core_type<tc>, window_params = [{pipeline_mode = #tpu.pipeline_mode<synchronous>, transform_indices = @transform_0, window_bounds = array<i64: 32, 192>}, {transform_indices = @transform_1, window_bounds = array<i64: 192, 128>}, {pipeline_mode = #tpu.pipeline_mode<synchronous>, transform_indices = @transform_2, window_bounds = array<i64: 128, 128>}, {transform_indices = @transform_3, window_bounds = array<i64: 2, 128>}, {transform_indices = @transform_4, window_bounds = array<i64: 2, 128>}, {transform_indices = @transform_5, window_bounds = array<i64: 1, 1>}, {transform_indices = @transform_6, window_bounds = array<i64: 32, 128>}]} {
    %c0 = arith.constant 0 : index
    %c0_0 = arith.constant 0 : index
    %0 = vector.load %arg1[%c0, %c0_0] : memref<32x192xf32, #tpu.memory_space<vmem>>, vector<32x192xf32>
    %c0_1 = arith.constant 0 : index
    %c0_2 = arith.constant 0 : index
    %1 = vector.load %arg2[%c0_1, %c0_2] : memref<192x128xf32, #tpu.memory_space<vmem>>, vector<192x128xf32>
    %cst = arith.constant dense<0.000000e+00> : vector<32x128xf32>
    %2 = tpu.matmul %0, %1, %cst {dimension_numbers = #tpu.dot_dimension_numbers<[1], [0], [0], [1], [0, 0, 1, 1], [], []>} : vector<32x192xf32>, vector<192x128xf32>, vector<32x128xf32> -> vector<32x128xf32>
    %c0_3 = arith.constant 0 : index
    %c0_4 = arith.constant 0 : index
    %3 = vector.load %arg7[%c0_3, %c0_4] : memref<32x128xf32, #tpu.memory_space<vmem>>, vector<32x128xf32>
    tpu.vector_store %arg7[%c0_3, %c0_4], %2 {strides = array<i32>} : memref<32x128xf32, #tpu.memory_space<vmem>>, vector<32x128xf32>,
    %cst_5 = arith.constant dense<0.000000e+00> : vector<128xf32>
    %4 = vector.multi_reduction <add>, %2, %cst_5 [0] : vector<32x128xf32> to vector<128xf32>
    %5 = vector.shape_cast %4 : vector<128xf32> to vector<1x128xf32>
    %6 = arith.mulf %2, %2 : vector<32x128xf32>
    %cst_6 = arith.constant dense<0.000000e+00> : vector<128xf32>
    %7 = vector.multi_reduction <add>, %6, %cst_6 [0] : vector<32x128xf32> to vector<128xf32>
    %8 = vector.shape_cast %7 : vector<128xf32> to vector<1x128xf32>
    %9 = tpu.concatenate %5, %8 in 0 : vector<1x128xf32>, vector<1x128xf32> -> vector<2x128xf32>
    %c0_7 = arith.constant 0 : index
    %c0_8 = arith.constant 0 : index
    %10 = vector.load %arg3[%c0_7, %c0_8] : memref<128x128xf32, #tpu.memory_space<vmem>>, vector<128x128xf32>
    %cst_9 = arith.constant dense<0.000000e+00> : vector<2x128xf32>
    %11 = tpu.matmul %9, %10, %cst_9 {dimension_numbers = #tpu.dot_dimension_numbers<[1], [0], [0], [1], [0, 0, 1, 1], [], []>} : vector<2x128xf32>, vector<128x128xf32>, vector<2x128xf32> -> vector<2x128xf32>
    %cst_10 = arith.constant 0.001953125 : f32
    %12 = vector.broadcast %cst_10 : f32 to vector<2x128xf32>
    %13 = arith.mulf %11, %12 : vector<2x128xf32>
    %14 = vector.extract_strided_slice %13 {offsets = [0, 0], sizes = [1, 128], strides = [1, 1]} : vector<2x128xf32> to vector<1x128xf32>
    %15 = vector.extract_strided_slice %13 {offsets = [1, 0], sizes = [1, 128], strides = [1, 1]} : vector<2x128xf32> to vector<1x128xf32>
    %16 = arith.mulf %14, %14 : vector<1x128xf32>
    %17 = arith.subf %15, %16 : vector<1x128xf32>
    %cst_11 = arith.constant 0.000000e+00 : f32
    %18 = vector.broadcast %cst_11 : f32 to vector<1x128xf32>
    %19 = arith.maximumf %17, %18 : vector<1x128xf32>
    %cst_12 = arith.constant 9.99999974E-6 : f32
    %20 = vector.broadcast %cst_12 : f32 to vector<1x128xf32>
    %21 = arith.addf %19, %20 : vector<1x128xf32>
    %22 = math.rsqrt %21 : vector<1x128xf32>
    %c0_13 = arith.constant 0 : index
    %c0_14 = arith.constant 0 : index
    %23 = memref.load %arg6[%c0_13, %c0_14] : memref<1x1xf32, #tpu.memory_space<smem>>
    %c0_15 = arith.constant 0 : index
    %c0_16 = arith.constant 0 : index
    %24 = vector.load %arg4[%c0_15, %c0_16] : memref<2x128xf32, #tpu.memory_space<vmem>>, vector<1x128xf32>
    %c0_17 = arith.constant 0 : index
    %c0_18 = arith.constant 0 : index
    %25 = vector.load %arg5[%c0_17, %c0_18] : memref<2x128xf32, #tpu.memory_space<vmem>>, vector<1x128xf32>
    %26 = arith.mulf %24, %22 : vector<1x128xf32>
    %27 = arith.mulf %26, %14 : vector<1x128xf32>
    %28 = arith.subf %25, %27 : vector<1x128xf32>
    %c0_19 = arith.constant 0 : index
    %c0_20 = arith.constant 0 : index
    %29 = vector.load %arg7[%c0_19, %c0_20] : memref<32x128xf32, #tpu.memory_space<vmem>>, vector<16x128xf32>
    %30 = vector.broadcast %26 : vector<1x128xf32> to vector<16x128xf32>
    %31 = arith.mulf %29, %30 : vector<16x128xf32>
    %32 = vector.broadcast %28 : vector<1x128xf32> to vector<16x128xf32>
    %33 = arith.addf %31, %32 : vector<16x128xf32>
    %cst_21 = arith.constant 0.000000e+00 : f32
    %34 = vector.broadcast %cst_21 : f32 to vector<16x128xf32>
    %35 = arith.cmpf oge, %33, %34 : vector<16x128xf32>
    %36 = vector.broadcast %23 : f32 to vector<16x128xf32>
    %37 = arith.mulf %36, %33 : vector<16x128xf32>
    %38 = arith.select %35, %33, %37 : vector<16x128xi1>, vector<16x128xf32>
    %c0_22 = arith.constant 0 : index
    %c0_23 = arith.constant 0 : index
    %39 = vector.load %arg7[%c0_22, %c0_23] : memref<32x128xf32, #tpu.memory_space<vmem>>, vector<16x128xf32>
    tpu.vector_store %arg7[%c0_22, %c0_23], %38 {strides = array<i32>} : memref<32x128xf32, #tpu.memory_space<vmem>>, vector<16x128xf32>,
    %c1 = arith.constant 1 : index
    %c0_24 = arith.constant 0 : index
    %40 = vector.load %arg4[%c1, %c0_24] : memref<2x128xf32, #tpu.memory_space<vmem>>, vector<1x128xf32>
    %c1_25 = arith.constant 1 : index
    %c0_26 = arith.constant 0 : index
    %41 = vector.load %arg5[%c1_25, %c0_26] : memref<2x128xf32, #tpu.memory_space<vmem>>, vector<1x128xf32>
    %42 = arith.mulf %40, %22 : vector<1x128xf32>
    %43 = arith.mulf %42, %14 : vector<1x128xf32>
    %44 = arith.subf %41, %43 : vector<1x128xf32>
    %c16 = arith.constant 16 : index
    %c0_27 = arith.constant 0 : index
    %45 = vector.load %arg7[%c16, %c0_27] : memref<32x128xf32, #tpu.memory_space<vmem>>, vector<16x128xf32>
    %46 = vector.broadcast %42 : vector<1x128xf32> to vector<16x128xf32>
    %47 = arith.mulf %45, %46 : vector<16x128xf32>
    %48 = vector.broadcast %44 : vector<1x128xf32> to vector<16x128xf32>
    %49 = arith.addf %47, %48 : vector<16x128xf32>
    %cst_28 = arith.constant 0.000000e+00 : f32
    %50 = vector.broadcast %cst_28 : f32 to vector<16x128xf32>
    %51 = arith.cmpf oge, %49, %50 : vector<16x128xf32>
    %52 = vector.broadcast %23 : f32 to vector<16x128xf32>
    %53 = arith.mulf %52, %49 : vector<16x128xf32>
    %54 = arith.select %51, %49, %53 : vector<16x128xi1>, vector<16x128xf32>
    %c16_29 = arith.constant 16 : index
    %c0_30 = arith.constant 0 : index
    %55 = vector.load %arg7[%c16_29, %c0_30] : memref<32x128xf32, #tpu.memory_space<vmem>>, vector<16x128xf32>
    tpu.vector_store %arg7[%c16_29, %c0_30], %54 {strides = array<i32>} : memref<32x128xf32, #tpu.memory_space<vmem>>, vector<16x128xf32>,
    return
  }
  func.func @transform_0(%arg0: i32) -> (i32, i32) {
    %c0_i32 = arith.constant 0 : i32
    %c0_i32_0 = arith.constant 0 : i32
    %c0_i32_1 = arith.constant 0 : i32
    return %c0_i32, %c0_i32_0 : i32, i32
  }
  func.func @transform_1(%arg0: i32) -> (i32, i32) {
    %c0_i32 = arith.constant 0 : i32
    %c0_i32_0 = arith.constant 0 : i32
    return %c0_i32, %arg0 : i32, i32
  }
  func.func @transform_2(%arg0: i32) -> (i32, i32) {
    %c0_i32 = arith.constant 0 : i32
    %c0_i32_0 = arith.constant 0 : i32
    %c0_i32_1 = arith.constant 0 : i32
    return %c0_i32, %c0_i32_0 : i32, i32
  }
  func.func @transform_3(%arg0: i32) -> (i32, i32) {
    %c0_i32 = arith.constant 0 : i32
    %c0_i32_0 = arith.constant 0 : i32
    return %c0_i32, %arg0 : i32, i32
  }
  func.func @transform_4(%arg0: i32) -> (i32, i32) {
    %c0_i32 = arith.constant 0 : i32
    %c0_i32_0 = arith.constant 0 : i32
    return %c0_i32, %arg0 : i32, i32
  }
  func.func @transform_5(%arg0: i32) -> (i32, i32) {
    %c0_i32 = arith.constant 0 : i32
    %c0_i32_0 = arith.constant 0 : i32
    %c0_i32_1 = arith.constant 0 : i32
    return %c0_i32, %c0_i32_0 : i32, i32
  }
  func.func @transform_6(%arg0: i32) -> (i32, i32) {
    %c0_i32 = arith.constant 0 : i32
    %c0_i32_0 = arith.constant 0 : i32
    return %c0_i32, %arg0 : i32, i32
  }
}

</mosaic_0001>

<bundles_post_ra>
// kernel: tpu_custom_call.1
= control target key start
LH: loop header
LB: loop body
LE: loop exit
PB: predicated region body
PF: predicated region fallthrough
CT: control target
= control target key end

     0   :  { %12 = vsyncpa [#allocation4], 0  ;;  %s545_s0 = inlined_call_operand.hbm [shape: f32[32,192], index: 0, kind: input, shape index: {}]   ;;  %s546_s1 = inlined_call_operand.hbm [shape: f32[192,128], index: 1, kind: input, shape index: {}]   ;;  %s547_s2 = inlined_call_operand.hbm [shape: f32[128,128], index: 2, kind: input, shape index: {}]   ;;  %s548_s3 = inlined_call_operand.vmem [shape: f32[2,128], index: 3, kind: input, shape index: {}]   ;;  %s549_s4 = inlined_call_operand.vmem [shape: f32[2,128], index: 4, kind: input, shape index: {}]   ;;  %s550_s5 = inlined_call_operand.<no memory space> [shape: f32[1,1], index: 5, kind: input, shape index: {}]   ;;  %s551_s6 = inlined_call_operand.hbm [shape: f32[32,128], index: 6, kind: output, shape index: {}]  }
   0x1   :  { %13 = vsyncpa [#allocation7], 0  ;;  %s32_s23 = sshll.u32 %s546_s1, 4  ;;  %s33_s23 = int_to_ptr.hbm [resolvable:$true] %s32_s23 }
   0x2   :  { %14 = vsyncpa [#allocation5], 0  ;;  %s456_s24 = smov [#allocation6]   ;;  %s19_s28 = sshll.u32 %s545_s0, 4  ;;  %s20_s28 = int_to_ptr.hbm [resolvable:$true] %s19_s28 }
   0x3   :  { %s34_s25 = sshll.u32 %s456_s24, 4  ;;  %s457_s29 = smov 128   ;;  %s35_s25 = int_to_ptr.vmem [resolvable:$true] %s34_s25 }
   0x4   :  { %s458_s30 = smov 8   ;;  %s459_s7 = smov [#allocation3]  }
   0x5   :  { %40 = dma.hbm_to_vmem [thread:$0]  %s33_s23, 3072, %s35_s25, [#allocation7], %s457_s29, %s457_s29, %s458_s30  }
   0x6   :  { %s21_s8 = sshll.u32 %s459_s7, 4  ;;  %s460_s1 = smov 256   ;;  %s22_s8 = int_to_ptr.vmem [resolvable:$true] %s21_s8 }
   0x7   :  { %s461_s9 = smov 16   ;;  %s45_s12 = sshll.u32 %s547_s2, 4  ;;  %s46_s12 = int_to_ptr.hbm [resolvable:$true] %s45_s12 }
   0x8   :  { %27 = dma.hbm_to_vmem [thread:$0]  %s20_s28, 1024, %s22_s8, [#allocation4], %s460_s1, %s460_s1, %s461_s9  }
   0x9   :  { %s462_s13 = smov [#allocation8]  }
   0xa   :  { %s47_s0 = sshll.u32 %s462_s13, 4  ;;  %s48_s0 = int_to_ptr.vmem [resolvable:$true] %s47_s0 }
   0xb   :  { %53 = dma.hbm_to_vmem [thread:$0]  %s46_s12, 2048, %s48_s0, [#allocation7], %s457_s29, %s457_s29, %s458_s30  }
   0xc   :  { %450 = dma.done.wait [#allocation4], 1024  }
   0xd   :  { %451 = vsyncadd [#allocation4], 4294966272 }
   0xe   :  { %452 = dma.done.wait [#allocation7], 5120  }
   0xf   :  { %453 = vsyncadd [#allocation7], 4294962176  ;;  %v95_v0 = vld [vmem:[#allocation6 + $0x78] sm:$0xff]  ;;  %v94_v1 = vld [vmem:[#allocation6 + $0x70] sm:$0xff]  ;;  %vm104_vm0 = vcmask 523264   ;;  %vm201_vm1 = vcmask 1040384  }
  0x10   :  { %117 = vmatpush.msra.mxu0 %v95_v0  ;;  %328 = vmatpush.msra.mxu3 %v95_v0  ;;  %v103_v2 = vld [vmem:[#allocation6 + $0xb8] sm:$0xff]  ;;  %v93_v3 = vld [vmem:[#allocation6 + $0x68] sm:$0xff]  ;;  %v102_v4 = vld [vmem:[#allocation6 + $0xb0] sm:$0xff]  ;;  %s310_s25 = sshll.u32 %s551_s6, 4  ;;  %s311_s25 = int_to_ptr.hbm [resolvable:$true] %s310_s25 }
  0x11   :  { %154 = vmatpush.msra.mxu1 %v103_v2  ;;  %v101_v5 = vld [vmem:[#allocation6 + $0xa8] sm:$0xff]  ;;  %v92_v6 = vld [vmem:[#allocation6 + $0x60] sm:$0xff]  ;;  %v91_v8 = vld [vmem:[#allocation6 + $0x58] sm:$0xff] }
  0x12   :  { %118 = vmatpush.msra.mxu0 %v94_v1  ;;  %329 = vmatpush.msra.mxu3 %v94_v1  ;;  %v100_v7 = vld [vmem:[#allocation6 + $0xa0] sm:$0xff]  ;;  %v99_v9 = vld [vmem:[#allocation6 + $0x98] sm:$0xff]  ;;  %v90_v10 = vld [vmem:[#allocation6 + $0x50] sm:$0xff] }
  0x13   :  { %155 = vmatpush.msra.mxu1 %v102_v4  ;;  %v98_v11 = vld [vmem:[#allocation6 + $0x90] sm:$0xff]  ;;  %v89_v12 = vld [vmem:[#allocation6 + $0x48] sm:$0xff]  ;;  %v88_v14 = vld [vmem:[#allocation6 + $0x40] sm:$0xff] }
  0x14   :  { %119 = vmatpush.msra.mxu0 %v93_v3  ;;  %330 = vmatpush.msra.mxu3 %v93_v3  ;;  %v97_v13 = vld [vmem:[#allocation6 + $0x88] sm:$0xff]  ;;  %v96_v15 = vld [vmem:[#allocation6 + $0x80] sm:$0xff]  ;;  %v87_v16 = vld [vmem:[#allocation6 + $0x38] sm:$0xff] }
  0x15   :  { %156 = vmatpush.msra.mxu1 %v101_v5  ;;  %v73_v17 = vld [vmem:[#allocation3 + $0x8] sm:$0xff]  ;;  %v86_v18 = vld [vmem:[#allocation6 + $0x30] sm:$0xff]  ;;  %v84_v20 = vld [vmem:[#allocation6 + $0x20] sm:$0xff] }
  0x16   :  { %120 = vmatpush.msra.mxu0 %v92_v6  ;;  %331 = vmatpush.msra.mxu3 %v92_v6  ;;  %v85_v19 = vld [vmem:[#allocation6 + $0x28] sm:$0xff]  ;;  %v83_v21 = vld [vmem:[#allocation6 + $0x18] sm:$0xff]  ;;  %v82_v23 = vld [vmem:[#allocation6 + $0x10] sm:$0xff] }
  0x17   :  { %157 = vmatpush.msra.mxu1 %v100_v7  ;;  %v75_v22 = vld [vmem:[#allocation3 + $0x18] sm:$0xff]  ;;  %v81_v24 = vld [vmem:[#allocation6 + $0x8] sm:$0xff]  ;;  %v80_v25 = vld [vmem:[#allocation6] sm:$0xff] }
  0x18   :  { %121 = vmatpush.msra.mxu0 %v91_v8  ;;  %332 = vmatpush.msra.mxu3 %v91_v8  ;;  %v72_v26 = vld [vmem:[#allocation3] sm:$0xff]  ;;  %v77_v28 = vld [vmem:[#allocation3 + $0x28] sm:$0xff]  ;;  %v74_v29 = vld [vmem:[#allocation3 + $0x10] sm:$0xff] }
  0x19   :  { %158 = vmatpush.msra.mxu1 %v99_v9  ;;  %v76_v27 = vld [vmem:[#allocation3 + $0x20] sm:$0xff]  ;;  %v78_v30 = vld [vmem:[#allocation3 + $0x30] sm:$0xff]  ;;  %v79_v31 = vld [vmem:[#allocation3 + $0x38] sm:$0xff] }
  0x1a   :  { %122 = vmatpush.msra.mxu0 %v90_v10  ;;  %333 = vmatpush.msra.mxu3 %v90_v10  ;;  %v218_v32 = vld [vmem:[#allocation8 + $0x78] sm:$0xff]  ;;  %v217_v33 = vld [vmem:[#allocation8 + $0x70] sm:$0xff]  ;;  %v216_v34 = vld [vmem:[#allocation8 + $0x68] sm:$0xff] }
  0x1b   :  { %159 = vmatpush.msra.mxu1 %v98_v11  ;;  %219 = vmatpush.msra.mxu2 %v218_v32  ;;  %v215_v35 = vld [vmem:[#allocation8 + $0x60] sm:$0xff]  ;;  %v214_v36 = vld [vmem:[#allocation8 + $0x58] sm:$0xff]  ;;  %v213_v37 = vld [vmem:[#allocation8 + $0x50] sm:$0xff] }
  0x1c   :  { %123 = vmatpush.msra.mxu0 %v89_v12  ;;  %334 = vmatpush.msra.mxu3 %v89_v12  ;;  %v212_v38 = vld [vmem:[#allocation8 + $0x48] sm:$0xff]  ;;  %v211_v39 = vld [vmem:[#allocation8 + $0x40] sm:$0xff]  ;;  %v210_v41 = vld [vmem:[#allocation8 + $0x38] sm:$0xff] }
  0x1d   :  { %160 = vmatpush.msra.mxu1 %v97_v13  ;;  %220 = vmatpush.msra.mxu2 %v217_v33  ;;  %v209_v42 = vld [vmem:[#allocation8 + $0x30] sm:$0xff]  ;;  %v208_v43 = vld [vmem:[#allocation8 + $0x28] sm:$0xff]  ;;  %v207_v44 = vld [vmem:[#allocation8 + $0x20] sm:$0xff] }
  0x1e   :  { %124 = vmatpush.msra.mxu0 %v88_v14  ;;  %335 = vmatpush.msra.mxu3 %v88_v14  ;;  %v206_v45 = vld [vmem:[#allocation8 + $0x18] sm:$0xff]  ;;  %v205_v47 = vld [vmem:[#allocation8 + $0x10] sm:$0xff]  ;;  %v204_v48 = vld [vmem:[#allocation8 + $0x8] sm:$0xff] }
  0x1f   :  { %161 = vmatpush.msra.mxu1 %v96_v15  ;;  %221 = vmatpush.msra.mxu2 %v216_v34  ;;  %v203_v49 = vld [vmem:[#allocation8] sm:$0xff] }
  0x20   :  { %125 = vmatpush.msra.mxu0 %v87_v16  ;;  %336 = vmatpush.msra.mxu3 %v87_v16  ;;  %v258_v33 = vld [vmem:[%s548_s3] sm:$0x1]  ;;  %v283_v34 = vld [vmem:[%s548_s3 + $0x1] sm:$0x1] }
  0x21   :  { %324 = vmatmul.msk.f32.vlgmr.msra.gmra.mxu1 %vm104_vm0, %v73_v17  ;;  %222 = vmatpush.msra.mxu2 %v215_v35 }
  0x22   :  { %126 = vmatpush.msra.mxu0 %v86_v18  ;;  %337 = vmatpush.msra.mxu3 %v86_v18 }
  0x23   :  { %223 = vmatpush.msra.mxu2 %v214_v36 }
  0x24   :  { %127 = vmatpush.msra.mxu0 %v85_v19  ;;  %338 = vmatpush.msra.mxu3 %v85_v19 }
  0x25   :  { %224 = vmatpush.msra.mxu2 %v213_v37 }
  0x26   :  { %128 = vmatpush.msra.mxu0 %v84_v20  ;;  %339 = vmatpush.msra.mxu3 %v84_v20 }
  0x27   :  { %225 = vmatpush.msra.mxu2 %v212_v38  ;;  %v259_v38 = vld [vmem:[%s549_s4] sm:$0x1] }
  0x28   :  { %129 = vmatpush.msra.mxu0 %v83_v21  ;;  %340 = vmatpush.msra.mxu3 %v83_v21 }
  0x29   :  { %325 = vmatmul.msk.f32.gmra.mxu1 %vm104_vm0, %v75_v22  ;;  %226 = vmatpush.msra.mxu2 %v211_v39  ;;  %v284_v39 = vld [vmem:[%s549_s4 + $0x1] sm:$0x1]  ;;  %s463_s4 = smov [#allocation9]  }
  0x2a   :  { %130 = vmatpush.msra.mxu0 %v82_v23  ;;  %341 = vmatpush.msra.mxu3 %v82_v23  ;;  %s308_s22 = sshll.u32 %s463_s4, 4  ;;  %s309_s22 = int_to_ptr.vmem [resolvable:$true] %s308_s22 }
  0x2b   :  { %227 = vmatpush.msra.mxu2 %v210_v41 }
  0x2c   :  { %131 = vmatpush.msra.mxu0 %v81_v24  ;;  %342 = vmatpush.msra.mxu3 %v81_v24 }
  0x2d   :  { %228 = vmatpush.msra.mxu2 %v209_v42 }
  0x2e   :  { %132 = vmatpush.msra.mxu0 %v80_v25  ;;  %343 = vmatpush.msra.mxu3 %v80_v25 }
  0x2f   :  { %133 = vmatmul.f32.vlgmr.msra.gmra.mxu0 %v72_v26  ;;  %139 = vmatmul.f32.vlgmr.msra.gmra.mxu3 %v76_v27 }
  0x30   :  { %229 = vmatpush.msra.mxu2 %v208_v43 }
  0x31   :  { %326 = vmatmul.msk.f32.gmra.mxu1 %vm104_vm0, %v77_v28 }
  0x32   :  { %230 = vmatpush.msra.mxu2 %v207_v44 }
  0x34   :  { %231 = vmatpush.msra.mxu2 %v206_v45 }
  0x36   :  { %232 = vmatpush.msra.mxu2 %v205_v47 }
  0x37   :  { %136 = vmatmul.f32.gmra.mxu0 %v74_v29  ;;  %142 = vmatmul.f32.gmra.mxu3 %v78_v30 }
  0x38   :  { %233 = vmatpush.msra.mxu2 %v204_v48 }
  0x39   :  { %327 = vmatmul.msk.f32.gmra.mxu1 %vm104_vm0, %v79_v31 }
  0x3a   :  { %234 = vmatpush.msra.mxu2 %v203_v49 }
  0x9e   :  { %v163_v40 = vpop.f32.mrf.mxu1 }
  0xa6   :  { %v166_v46 = vpop.f32.mrf.mxu1 }
  0xac   :  { %v134_v50 = vpop.f32.mrf.mxu0 }
  0xad   :  { %v518_v53 = vadd.f32 %v163_v40, %v134_v50 }
  0xae   :  { %v169_v51 = vpop.f32.mrf.mxu1 }
  0xaf   :  { %v188_v56 = vmul.f32 %v518_v53, %v518_v53 }
  0xb2   :  { %v140_v52 = vpop.f32.mrf.mxu3 }
  0xb3   :  { %v170_v57 = vadd.f32 %v169_v51, %v140_v52  ;;  %v276_v52 = vstv %s550_s5 }
  0xb4   :  { %v137_v54 = vpop.f32.mrf.mxu0 }
  0xb5   :  { %v167_v55 = vadd.f32 %v166_v46, %v137_v54  ;;  %v190_v63 = vmul.f32 %v170_v57, %v170_v57 }
  0xb6   :  { %v172_v60 = vpop.f32.mrf.mxu1 }
  0xb7   :  { %v179_v58 = vadd.f32 %v167_v55, %v518_v53  ;;  %v189_v59 = vmul.f32 %v167_v55, %v167_v55 }
  0xb9   :  { %v192_v61 = vadd.f32 %v189_v59, %v188_v56  ;;  %v180_v1 = vadd.f32 %v179_v58, %v170_v57 }
  0xba   :  { %v143_v62 = vpop.f32.mrf.mxu3 }
  0xbb   :  { %v173_v0 = vadd.f32 %v172_v60, %v143_v62  ;;  %v193_v4 = vadd.f32 %v192_v61, %v190_v63 }
  0xbd   :  { %v181_v2 = vadd.f32 %v180_v1, %v173_v0  ;;  %v191_v3 = vmul.f32 %v173_v0, %v173_v0 }
  0xbf   :  { %v182_v5 = vrot.slane %v181_v2, 4  ;;  %v194_v6 = vadd.f32 %v193_v4, %v191_v3 }
  0xc1   :  { %v183_v7 = vadd.f32 %v182_v5, %v181_v2  ;;  %v195_v8 = vrot.slane %v194_v6, 4 }
  0xc3   :  { %v184_v9 = vrot.slane %v183_v7, 2  ;;  %v196_v10 = vadd.f32 %v195_v8, %v194_v6 }
  0xc5   :  { %v185_v11 = vadd.f32 %v184_v9, %v183_v7  ;;  %v197_v12 = vrot.slane %v196_v10, 2 }
  0xc7   :  { %v186_v13 = vrot.slane %v185_v11, 1  ;;  %v198_v14 = vadd.f32 %v197_v12, %v196_v10 }
  0xc9   :  { %v199_v15 = vrot.slane %v198_v14, 1  ;;  %v187_v16 = vadd.f32 %v186_v13, %v185_v11 }
  0xcb   :  { %v200_v17 = vadd.f32 %v199_v15, %v198_v14 }
  0xcd   :  { %v202_v18 = vsel %vm201_vm1, %v187_v16, %v200_v17 }
  0xce   :  { %235 = vmatmul.f32.vlgmr.msra.gmra.mxu2 %v202_v18 }
 0x151   :  { %v236_v19 = vpop.f32.mrf.mxu2 }
 0x152   :  { %v239_v20 = vmul.f32 0.001953125, %v236_v19 }
 0x154   :  { %v240_v21 = vmul.f32 %v239_v20, %v239_v20 }
 0x156   :  { %v242_v22 = vrot.slane %v240_v21, 7 }
 0x158   :  { %v244_v23 = vsub.f32 %v239_v20, %v242_v22 }
 0x15a   :  { %v245_v24 = vmax.f32 %v244_v23, 0.0 }
 0x15c   :  { %v246_v25 = vadd.f32 1e-05, %v245_v24 }
 0x15e   :  { %352 = vrsqrt.f32 %v246_v25  ;;  %vm253_vm3 = vweird.f32 %v246_v25 }
 0x164   :  { %v353_v26 = vpop.eup %352 }
 0x165   :  { %v248_v27 = vmul.f32 %v353_v26, %v246_v25  ;;  %vm254_vm2 = vweird.f32 %v353_v26 }
 0x166   :  { %vm255_vm4 = vmor %vm253_vm3, %vm254_vm2 }
 0x167   :  { %v249_v28 = vmul.f32 %v353_v26, %v248_v27 }
 0x169   :  { %v250_v29 = vmul.f32 0.5, %v249_v28 }
 0x16b   :  { %v251_v30 = vsub.f32 1.5, %v250_v29 }
 0x16d   :  { %v252_v31 = vmul.f32 %v353_v26, %v251_v30 }
 0x16f   :  { %v256_v32 = vsel %vm255_vm4, %v353_v26, %v252_v31 }
 0x170   :  { %v261_v35 = vrot.slane %v256_v32, 1 }
 0x172   :  { %v263_v36 = vmul.f32 %v261_v35, %v258_v33  ;;  %v285_v37 = vmul.f32 %v283_v34, %v261_v35 }
 0x174   :  { %v264_v40 = vmul.f32 %v263_v36, %v239_v20  ;;  %v268_v41 = vperm.slane %v263_v36, 0  ;;  %v286_v42 = vmul.f32 %v285_v37, %v239_v20  ;;  %v290_v43 = vperm.slane %v285_v37, 0 }
 0x176   :  { %v265_v44 = vsub.f32 %v259_v38, %v264_v40  ;;  %v287_v45 = vsub.f32 %v284_v39, %v286_v42  ;;  %v269_v46 = vmul.f32 %v268_v41, %v518_v53  ;;  %v270_v47 = vmul.f32 %v268_v41, %v167_v55 }
 0x177   :  { %v291_v49 = vmul.f32 %v290_v43, %v170_v57  ;;  %v292_v50 = vmul.f32 %v290_v43, %v173_v0 }
 0x178   :  { %v271_v48 = vperm.slane %v265_v44, 0  ;;  %v293_v51 = vperm.slane %v287_v45, 0 }
 0x17a   :  { %v272_v54 = vadd.f32 %v271_v48, %v269_v46  ;;  %v273_v56 = vadd.f32 %v271_v48, %v270_v47  ;;  %v294_v58 = vadd.f32 %v293_v51, %v291_v49  ;;  %v295_v59 = vadd.f32 %v293_v51, %v292_v50 }
 0x17c   :  { %vm274_vm5 = vcmp.ge.f32.partialorder %v272_v54, 0.0  ;;  %vm275_vm6 = vcmp.ge.f32.partialorder %v273_v56, 0.0  ;;  %v277_v60 = vmul.f32 %v276_v52, %v272_v54  ;;  %v278_v61 = vmul.f32 %v276_v52, %v273_v56 }
 0x17d   :  { %vm296_vm7 = vcmp.ge.f32.partialorder %v294_v58, 0.0  ;;  %vm297_vm8 = vcmp.ge.f32.partialorder %v295_v59, 0.0  ;;  %v298_v53 = vmul.f32 %v294_v58, %v276_v52  ;;  %v299_v55 = vmul.f32 %v295_v59, %v276_v52 }
 0x17e   :  { %v279_v57 = vsel %vm274_vm5, %v272_v54, %v277_v60  ;;  %v280_v62 = vsel %vm275_vm6, %v273_v56, %v278_v61 }
 0x17f   :  { %281 = vst [vmem:[#allocation9] sm:$0xff] %v279_v57  ;;  %v300_v63 = vsel %vm296_vm7, %v294_v58, %v298_v53  ;;  %v301_v0 = vsel %vm297_vm8, %v295_v59, %v299_v55 }
 0x180   :  { %282 = vst [vmem:[#allocation9 + $0x8] sm:$0xff] %v280_v62 }
 0x181   :  { %302 = vst [vmem:[#allocation9 + $0x10] sm:$0xff] %v300_v63 }
 0x182   :  { %303 = vst [vmem:[#allocation9 + $0x18] sm:$0xff] %v301_v0 }
 0x183   :  { %316 = dma.vmem_to_hbm [thread:$0]  %s309_s22, 512, %s311_s25, [#allocation5], %s457_s29, %s457_s29, %s458_s30  }
 0x184   :  { %454 = dma.done.wait [#allocation5], 512  }
 0x185   :  { %455 = vsyncadd [#allocation5], 4294966784 }
 0x186   :  { %321 = vsyncpa [#allocation4], 1 }
 0x187   :  { %322 = vsyncpa [#allocation7], 1 }
 0x188   :  { %323 = vsyncpa [#allocation5], 1 }

</bundles_post_ra>
